<compile_context>
chip_gen: v7x
topology: tpu7x:2x2x1
jax: 0.10.0
libtpu: 0.0.40
codegen_flags: <defaults>
</compile_context>

<pallas_src>
import functools
import math

import jax
import jax.numpy as jnp
from jax.experimental import pallas as pl
from jax.experimental.pallas import tpu as pltpu


_LANE = 128
_FUSED_MAX_ROWS = 256      # <= 128 KiB f32 per batch slab: fused single-pass path
_TILE_MAX_ROWS = 1024      # up to 512 KiB f32 per tile for the tiled two-pass path
_AMIN = 1e-10
_REF_VALUE = 1.0
_DB_SCALE = 10.0 / math.log(10.0)   # 10*log10(y) == _DB_SCALE * ln(y)


# ---------------------------------------------------------------------------
# Fused kernels (small slabs: one batch element = one tile, grid=(B,))
# ---------------------------------------------------------------------------

def _whiten_fused_kernel(x_ref, o_ref, *, n_valid, inv_nm1):
    # Shifted-sums variance (shift = first element) -> numerically stable even
    # when |mean| >> std.  x_ref is re-read per use (VMEM-resident vld) instead
    # of keeping one big value live across reductions + store (avoids spills).
    shift = x_ref[0:1, 0:1].astype(jnp.float32)
    d = x_ref[...].astype(jnp.float32) - shift
    s = jnp.sum(d, keepdims=True)
    ss = jnp.sum(d * d, keepdims=True)
    mean = shift + s * (1.0 / n_valid)
    var = jnp.maximum((ss - s * s * (1.0 / n_valid)) * inv_nm1, 0.0)
    inv_std = jax.lax.rsqrt(var)
    o_ref[...] = ((x_ref[...].astype(jnp.float32) - mean) * inv_std).astype(o_ref.dtype)


def _db_fused_kernel(x_ref, o_ref, *, top_db, amin, db_offset):
    # max over RAW x (log is monotonic) -> floor; single f32 clamp + single store.
    raw_max = jnp.max(x_ref[...].astype(jnp.float32), keepdims=True)
    floor = _DB_SCALE * jnp.log(jnp.maximum(raw_max, amin)) - (db_offset + top_db)
    x_db = _DB_SCALE * jnp.log(jnp.maximum(x_ref[...].astype(jnp.float32), amin))
    if db_offset != 0.0:               # constant-folded; 0 for ref_value=1.0
        x_db = x_db - db_offset
    o_ref[...] = jnp.maximum(x_db, floor).astype(o_ref.dtype)


# ---------------------------------------------------------------------------
# Tiled two-pass kernels (grid=(B, n_tiles))
# ---------------------------------------------------------------------------

def _whiten_stats_kernel(x_ref, mean_ref, scale_ref, shift_sc, s_sc, ss_sc,
                         *, n_valid, inv_nm1):
    t = pl.program_id(1)

    @pl.when(t == 0)
    def _init():
        shift_sc[...] = x_ref[0:1, 0:1].astype(jnp.float32)
        s_sc[...] = jnp.zeros_like(s_sc)
        ss_sc[...] = jnp.zeros_like(ss_sc)

    d = x_ref[...].astype(jnp.float32) - shift_sc[...]
    s_sc[...] += jnp.sum(d, keepdims=True)
    ss_sc[...] += jnp.sum(d * d, keepdims=True)

    @pl.when(t == pl.num_programs(1) - 1)
    def _finalize():
        s = s_sc[...]
        ss = ss_sc[...]
        mean = shift_sc[...] + s * (1.0 / n_valid)
        var = jnp.maximum((ss - s * s * (1.0 / n_valid)) * inv_nm1, 0.0)
        mean_ref[...] = mean
        scale_ref[...] = jax.lax.rsqrt(var)


def _whiten_apply_kernel(mean_ref, scale_ref, x_ref, o_ref):
    x = x_ref[...].astype(jnp.float32)
    o_ref[...] = ((x - mean_ref[...]) * scale_ref[...]).astype(o_ref.dtype)


def _db_stats_kernel(x_ref, floor_ref, max_sc, *, top_db, amin, db_offset):
    # Zero transcendentals per element: just a running max of raw x.
    t = pl.program_id(1)

    @pl.when(t == 0)
    def _init():
        max_sc[...] = jnp.full_like(max_sc, -jnp.inf)

    max_sc[...] = jnp.maximum(
        max_sc[...], jnp.max(x_ref[...].astype(jnp.float32), keepdims=True))

    @pl.when(t == pl.num_programs(1) - 1)
    def _finalize():
        floor_ref[...] = (_DB_SCALE * jnp.log(jnp.maximum(max_sc[...], amin))
                          - (db_offset + top_db))


def _db_apply_kernel(floor_ref, x_ref, o_ref, *, amin, db_offset):
    x = x_ref[...].astype(jnp.float32)
    x_db = _DB_SCALE * jnp.log(jnp.maximum(x, amin))
    if db_offset != 0.0:
        x_db = x_db - db_offset
    o_ref[...] = jnp.maximum(x_db, floor_ref[...]).astype(o_ref.dtype)


# ---------------------------------------------------------------------------
# Wrapper helpers
# ---------------------------------------------------------------------------

def _choose_tile_rows(rows, max_rows):
    if rows <= max_rows:
        return rows
    tr = max_rows - (max_rows % 8)
    while tr >= 8:
        if rows % tr == 0:
            return tr
        tr -= 8
    # TODO(synk): mask the ragged last row-tile instead of a whole-slab fallback.
    return rows


def _vmem_limit_bytes(tile_rows, lane, itemsize):
    # Double-buffered in + out tiles in the native dtype plus f32 temporaries,
    # with ~30% of physical VMEM left for Mosaic internal scratch (v7x-safe).
    try:
        info = pltpu.get_tpu_info()
        cap = int(getattr(info, "vmem_capacity_bytes", 64 * 2 ** 20))
    except Exception:
        cap = 64 * 2 ** 20
    tile_native = tile_rows * lane * itemsize
    tile_f32 = tile_rows * lane * 4
    want = 4 * tile_native + 4 * tile_f32 + (2 << 20)
    return int(max(4 << 20, min(want, int(cap * 0.7))))


def _x_tile_spec(tile_rows, lane, n_tiles, deep_buffer):
    idx = lambda b, t: (b, t, 0)
    if deep_buffer and n_tiles >= 3:
        try:
            # v7x: 3-deep input buffering keeps the 3.2 TB/s HBM pipe full.
            return pl.BlockSpec((None, tile_rows, lane), idx,
                                pipeline_mode=pl.Buffered(3))
        except TypeError:
            pass
    return pl.BlockSpec((None, tile_rows, lane), idx)


# ---------------------------------------------------------------------------
# Public wrapper
# ---------------------------------------------------------------------------

def spec_normalization(x, norm_type, top_db=80.0, *,
                       max_fused_rows=_FUSED_MAX_ROWS,
                       max_tile_rows=_TILE_MAX_ROWS):
    """Pallas equivalent of SpecNormalization(norm_type, top_db)(x); x is NCHW."""
    if norm_type not in ('whiten', 'db'):
        return x                                     # identity path

    B, C, H, W = x.shape
    n = C * H * W
    itemsize = jnp.dtype(x.dtype).itemsize

    # Layout: lane-dense (rows, 128) when it's a free reshape; otherwise keep the
    # natural (C*H, W) layout -> no jnp.pad / slice HBM round trips, ever.
    if n % _LANE == 0:
        rows, lane = n // _LANE, _LANE
    else:
        rows, lane = C * H, W
    xf = x.reshape(B, rows, lane)

    amin = _AMIN
    db_offset = 10.0 * math.log10(max(amin, _REF_VALUE))   # 0.0 for ref_value=1.0
    n_valid = float(n)
    inv_nm1 = 1.0 / (n - 1.0) if n > 1 else 1.0             # torch.std: unbiased

    # ---------------- fused fast path (small per-batch slabs) ----------------
    if rows <= max_fused_rows:
        spec = pl.BlockSpec((None, rows, lane), lambda b: (b, 0, 0))
        vmem_limit = _vmem_limit_bytes(rows, lane, itemsize)
        if norm_type == 'whiten':
            kernel = functools.partial(_whiten_fused_kernel,
                                       n_valid=n_valid, inv_nm1=inv_nm1)
            cost = pl.CostEstimate(flops=int(6 * B * n), transcendentals=int(B),
                                   bytes_accessed=int(2 * B * n * itemsize))
        else:
            kernel = functools.partial(_db_fused_kernel, top_db=float(top_db),
                                       amin=amin, db_offset=db_offset)
            cost = pl.CostEstimate(flops=int(4 * B * n),
                                   transcendentals=int(B * n + B),
                                   bytes_accessed=int(2 * B * n * itemsize))
        out = pl.pallas_call(
            kernel,
            out_shape=jax.ShapeDtypeStruct((B, rows, lane), x.dtype),
            grid=(B,),
            in_specs=[spec],
            out_specs=spec,
            compiler_params=pltpu.CompilerParams(
                dimension_semantics=("parallel",),
                vmem_limit_bytes=vmem_limit),
            cost_estimate=cost,
        )(xf)
        return out.reshape(B, C, H, W)

    # ---------------- tiled two-pass path (large per-batch slabs) ------------
    tile_rows = _choose_tile_rows(rows, max_tile_rows)
    n_tiles = rows // tile_rows
    vmem_limit = _vmem_limit_bytes(tile_rows, lane, itemsize)

    x_spec = pl.BlockSpec((None, tile_rows, lane), lambda b, t: (b, t, 0))
    x_apply_spec = _x_tile_spec(tile_rows, lane, n_tiles, deep_buffer=True)
    scalar_spec = pl.BlockSpec((None, 1, 1), lambda b, t: (b, 0, 0))
    stats_params = pltpu.CompilerParams(
        dimension_semantics=("parallel", "arbitrary"),
        vmem_limit_bytes=vmem_limit)
    apply_params = pltpu.CompilerParams(
        dimension_semantics=("parallel", "parallel"),
        vmem_limit_bytes=vmem_limit)

    if norm_type == 'whiten':
        mean_arr, scale_arr = pl.pallas_call(
            functools.partial(_whiten_stats_kernel, n_valid=n_valid, inv_nm1=inv_nm1),
            out_shape=(jax.ShapeDtypeStruct((B, 1, 1), jnp.float32),
                       jax.ShapeDtypeStruct((B, 1, 1), jnp.float32)),
            grid=(B, n_tiles),
            in_specs=[x_spec],
            out_specs=(scalar_spec, scalar_spec),
            scratch_shapes=[pltpu.VMEM((1, 1), jnp.float32)] * 3,
            compiler_params=stats_params,
            cost_estimate=pl.CostEstimate(flops=int(4 * B * n), transcendentals=int(B),
                                          bytes_accessed=int(B * n * itemsize)),
        )(xf)
        out = pl.pallas_call(
            _whiten_apply_kernel,
            out_shape=jax.ShapeDtypeStruct((B, rows, lane), x.dtype),
            grid=(B, n_tiles),
            in_specs=[scalar_spec, scalar_spec, x_apply_spec],
            out_specs=x_spec,
            compiler_params=apply_params,
            cost_estimate=pl.CostEstimate(flops=int(2 * B * n), transcendentals=0,
                                          bytes_accessed=int(2 * B * n * itemsize)),
        )(mean_arr, scale_arr, xf)
    else:  # 'db'
        floor_arr = pl.pallas_call(
            functools.partial(_db_stats_kernel, top_db=float(top_db),
                              amin=amin, db_offset=db_offset),
            out_shape=jax.ShapeDtypeStruct((B, 1, 1), jnp.float32),
            grid=(B, n_tiles),
            in_specs=[x_spec],
            out_specs=scalar_spec,
            scratch_shapes=[pltpu.VMEM((1, 1), jnp.float32)],
            compiler_params=stats_params,
            cost_estimate=pl.CostEstimate(flops=int(B * n), transcendentals=int(B),
                                          bytes_accessed=int(B * n * itemsize)),
        )(xf)
        out = pl.pallas_call(
            functools.partial(_db_apply_kernel, amin=amin, db_offset=db_offset),
            out_shape=jax.ShapeDtypeStruct((B, rows, lane), x.dtype),
            grid=(B, n_tiles),
            in_specs=[scalar_spec, x_apply_spec],
            out_specs=x_spec,
            compiler_params=apply_params,
            cost_estimate=pl.CostEstimate(flops=int(3 * B * n), transcendentals=int(B * n),
                                          bytes_accessed=int(2 * B * n * itemsize)),
        )(floor_arr, xf)

    return out.reshape(B, C, H, W)


# ---------------------------------------------------------------------------
# Pure-JAX references for sanity checking
# ---------------------------------------------------------------------------

def _whiten_ref(x):
    mean = jnp.mean(x, axis=(1, 2, 3), keepdims=True)
    std = jnp.std(x, axis=(1, 2, 3), keepdims=True, ddof=1)   # torch.std unbiased
    return (x - mean) / std


def _db_ref(x, top_db=80.0, amin=1e-10, ref_value=1.0):
    x_db = 10.0 * jnp.log10(jnp.maximum(x, amin))
    x_db = x_db - 10.0 * jnp.log10(jnp.maximum(amin, ref_value))
    floor = jnp.max(x_db, axis=(1, 2, 3), keepdims=True) - top_db
    return jnp.maximum(x_db, floor)


# ---------------------------------------------------------------------------
# Main
# ---------------------------------------------------------------------------

if __name__ == "__main__":
    key = jax.random.PRNGKey(0)
    k1, k2, k3, k4 = jax.random.split(key, 4)

    # Primary small shapes (fused single-tile path).  Non-zero mean on the
    # whiten input exercises the numerically-stable variance path.
    B, C, H, W = 2, 4, 16, 16
    x_whiten = jax.random.normal(k1, (B, C, H, W), dtype=jnp.float32) + 3.0
    out_w = jax.block_until_ready(spec_normalization(x_whiten, 'whiten'))
    assert jnp.allclose(out_w, _whiten_ref(x_whiten), atol=1e-4, rtol=1e-4), \
        "whiten (fused) mismatch"

    x_db = jax.random.uniform(k2, (B, C, H, W), dtype=jnp.float32,
                              minval=0.0, maxval=10.0)
    out_d = jax.block_until_ready(spec_normalization(x_db, 'db', top_db=80.0))
    assert jnp.allclose(out_d, _db_ref(x_db, top_db=80.0), atol=1e-4, rtol=1e-4), \
        "db (fused) mismatch"

    # Identity path.
    out_id = jax.block_until_ready(spec_normalization(x_whiten, 'none'))
    assert jnp.array_equal(out_id, x_whiten), "identity mismatch"

    # Tiled two-pass path, forced at (still small) shapes via tiny tile limits.
    Bt, Ct, Ht, Wt = 2, 4, 32, 16
    x_w2 = jax.random.normal(k3, (Bt, Ct, Ht, Wt), dtype=jnp.float32) * 0.5 + 3.0
    out_w2 = jax.block_until_ready(
        spec_normalization(x_w2, 'whiten', max_fused_rows=0, max_tile_rows=8))
    assert jnp.allclose(out_w2, _whiten_ref(x_w2), atol=2e-4, rtol=1e-4), \
        "whiten (tiled) mismatch"

    x_d2 = jax.random.uniform(k4, (Bt, Ct, Ht, Wt), dtype=jnp.float32,
                              minval=0.0, maxval=5.0)
    out_d2 = jax.block_until_ready(
        spec_normalization(x_d2, 'db', top_db=80.0, max_fused_rows=0, max_tile_rows=8))
    assert jnp.allclose(out_d2, _db_ref(x_d2, top_db=80.0), atol=1e-4, rtol=1e-4), \
        "db (tiled) mismatch"

    print("KERNEL_OK")
</pallas_src>

<mosaic_0001>
module attributes {stable_mosaic.version = 11 : i64} {
  func.func @_whiten_fused_kernel(%arg0: i32, %arg1: memref<1x8x128xf32, #tpu.memory_space<vmem>>, %arg2: memref<1x8x128xf32, #tpu.memory_space<vmem>>) attributes {dimension_semantics = [#tpu.dimension_semantics<parallel>], iteration_bounds = array<i64: 2>, scalar_prefetch = 0 : i64, scratch_operands = 0 : i64, tpu.core_type = #tpu.core_type<tc>, window_params = [{transform_indices = @transform_0, window_bounds = array<i64: 1, 8, 128>}, {transform_indices = @transform_1, window_bounds = array<i64: 1, 8, 128>}]} {
    %c0 = arith.constant 0 : index
    %c0_0 = arith.constant 0 : index
    %c0_1 = arith.constant 0 : index
    %0 = vector.load %arg1[%c0, %c0_0, %c0_1] : memref<1x8x128xf32, #tpu.memory_space<vmem>>, vector<1x1x1xf32>
    %1 = vector.shape_cast %0 : vector<1x1x1xf32> to vector<1x1xf32>
    %c0_2 = arith.constant 0 : index
    %c0_3 = arith.constant 0 : index
    %c0_4 = arith.constant 0 : index
    %2 = vector.load %arg1[%c0_2, %c0_3, %c0_4] : memref<1x8x128xf32, #tpu.memory_space<vmem>>, vector<1x8x128xf32>
    %3 = vector.shape_cast %2 : vector<1x8x128xf32> to vector<8x128xf32>
    %4 = vector.broadcast %1 : vector<1x1xf32> to vector<8x128xf32>
    %5 = arith.subf %3, %4 : vector<8x128xf32>
    %6 = vector.shape_cast %5 : vector<8x128xf32> to vector<1x8x128xf32>
    %cst = arith.constant dense<0.000000e+00> : vector<1xf32>
    %7 = vector.multi_reduction <add>, %6, %cst [1, 2] : vector<1x8x128xf32> to vector<1xf32>
    %8 = vector.shape_cast %7 : vector<1xf32> to vector<1x1x1xf32>
    %9 = vector.extract %8[0, 0, 0] : f32 from vector<1x1x1xf32>
    %10 = vector.broadcast %9 : f32 to vector<1x1xf32>
    %11 = arith.mulf %5, %5 : vector<8x128xf32>
    %12 = vector.shape_cast %11 : vector<8x128xf32> to vector<1x8x128xf32>
    %cst_5 = arith.constant dense<0.000000e+00> : vector<1xf32>
    %13 = vector.multi_reduction <add>, %12, %cst_5 [1, 2] : vector<1x8x128xf32> to vector<1xf32>
    %14 = vector.shape_cast %13 : vector<1xf32> to vector<1x1x1xf32>
    %15 = vector.extract %14[0, 0, 0] : f32 from vector<1x1x1xf32>
    %16 = vector.broadcast %15 : f32 to vector<1x1xf32>
    %cst_6 = arith.constant 9.765625E-4 : f32
    %17 = vector.broadcast %cst_6 : f32 to vector<1x1xf32>
    %18 = arith.mulf %10, %17 : vector<1x1xf32>
    %19 = arith.addf %1, %18 : vector<1x1xf32>
    %20 = arith.mulf %10, %10 : vector<1x1xf32>
    %cst_7 = arith.constant 9.765625E-4 : f32
    %21 = vector.broadcast %cst_7 : f32 to vector<1x1xf32>
    %22 = arith.mulf %20, %21 : vector<1x1xf32>
    %23 = arith.subf %16, %22 : vector<1x1xf32>
    %cst_8 = arith.constant 9.77517105E-4 : f32
    %24 = vector.broadcast %cst_8 : f32 to vector<1x1xf32>
    %25 = arith.mulf %23, %24 : vector<1x1xf32>
    %cst_9 = arith.constant 0.000000e+00 : f32
    %26 = vector.broadcast %cst_9 : f32 to vector<1x1xf32>
    %27 = arith.maximumf %25, %26 : vector<1x1xf32>
    %28 = math.rsqrt %27 : vector<1x1xf32>
    %c0_10 = arith.constant 0 : index
    %c0_11 = arith.constant 0 : index
    %c0_12 = arith.constant 0 : index
    %29 = vector.load %arg1[%c0_10, %c0_11, %c0_12] : memref<1x8x128xf32, #tpu.memory_space<vmem>>, vector<1x8x128xf32>
    %30 = vector.shape_cast %29 : vector<1x8x128xf32> to vector<8x128xf32>
    %31 = vector.broadcast %19 : vector<1x1xf32> to vector<8x128xf32>
    %32 = arith.subf %30, %31 : vector<8x128xf32>
    %33 = vector.broadcast %28 : vector<1x1xf32> to vector<8x128xf32>
    %34 = arith.mulf %32, %33 : vector<8x128xf32>
    %c0_13 = arith.constant 0 : index
    %c0_14 = arith.constant 0 : index
    %c0_15 = arith.constant 0 : index
    %35 = vector.load %arg2[%c0_13, %c0_14, %c0_15] : memref<1x8x128xf32, #tpu.memory_space<vmem>>, vector<1x8x128xf32>
    %36 = vector.shape_cast %35 : vector<1x8x128xf32> to vector<8x128xf32>
    %37 = vector.shape_cast %34 : vector<8x128xf32> to vector<1x8x128xf32>
    tpu.vector_store %arg2[%c0_13, %c0_14, %c0_15], %37 {strides = array<i32>} : memref<1x8x128xf32, #tpu.memory_space<vmem>>, vector<1x8x128xf32>,
    return
  }
  func.func @transform_0(%arg0: i32) -> (i32, i32, i32) {
    %c0_i32 = arith.constant 0 : i32
    %c0_i32_0 = arith.constant 0 : i32
    %c0_i32_1 = arith.constant 0 : i32
    return %arg0, %c0_i32, %c0_i32_0 : i32, i32, i32
  }
  func.func @transform_1(%arg0: i32) -> (i32, i32, i32) {
    %c0_i32 = arith.constant 0 : i32
    %c0_i32_0 = arith.constant 0 : i32
    %c0_i32_1 = arith.constant 0 : i32
    return %arg0, %c0_i32, %c0_i32_0 : i32, i32, i32
  }
}

</mosaic_0001>

<bundles_post_ra>
// kernel: tpu_custom_call.1
= control target key start
LH: loop header
LB: loop body
LE: loop exit
PB: predicated region body
PF: predicated region fallthrough
CT: control target
= control target key end

     0   :  { %6 = vsyncpa [#allocation3], 0  ;;  %s602_s0 = inlined_call_operand.hbm [shape: f32[2,8,128], index: 0, kind: input, shape index: {}]   ;;  %s603_s1 = inlined_call_operand.hbm [shape: f32[2,8,128], index: 1, kind: output, shape index: {}]  }
   0x1   :  { %8 = vsyncpa [#allocation3 + $0x1], 0 }
   0x2   :  { %9 = vsyncpa [#allocation4], 0 }
   0x3   :  { %11 = vsyncpa [#allocation4 + $0x1], 0  ;;  %s437_s6 = smov 0   ;;  %s439_s7 = smov 0  }
   0x4   :  { %s441_s8 = smov 0   ;;  %s443_s9 = smov 0  }
   0x5 LB: > { %s458_s10 = sadd.s32 4294967295, %s423_s9   ;;  %s259_s11 = sadd.s32 4294967294, %s423_s9   ;;  %s423_s9 = sphi %s443_s9, %s618_s9   ;;  %s419_s8 = sphi %s441_s8, %s617_s8   ;;  %s415_s7 = sphi %s439_s7, %s616_s7   ;;  %s411_s6 = sphi %s437_s6, %s615_s6  }
   0x6   : > { %s462_s12 = sadd.s32 1, %s423_s9   ;;  %s24_s13 = sadd.s32 1, %s419_s8 }
   0x7   : > { %s21_s14 = ssub.s32 %s423_s9, %s462_s12  ;;  %p31_p0 = scmp.ne.s32.totalorder %s419_s8, %s415_s7 }
   0x8   : > { %p22_p1 = scmp.eq.s32.totalorder %s21_s14, 0  ;;  %p32_p2 = scmp.eq.s32.totalorder %s423_s9, 0 }
   0x9   : > { %p37_p3 = scmp.ne.s32.totalorder %s415_s7, %s411_s6  ;;  %p38_p4 = scmp.eq.s32.totalorder %s458_s10, 0 }
   0xa   : > { %s474_s15 = scalar_select %p22_p1, %s419_s8, %s24_s13  }
   0xb   : > { %p476_p5 = por %p32_p2, %p31_p0  ;;  %p480_p6 = por %p38_p4, %p37_p3 }
   0xc   : > { %p61_p7 = scmp.eq.s32.totalorder %s458_s10, 1  ;;  %p67_p8 = scmp.eq.s32.totalorder %s259_s11, 1 }
   0xd   : > { %p291_p10 = scmp.lt.s32.totalorder %s423_s9, 2  ;;  %s87_s20 = sand.u32 1, %s419_s8  }
   0xe   : > { %p487_p11 = por %p61_p7, %p31_p0  ;;  %p491_p12 = por %p67_p8, %p37_p3 }
   0xf   : > { %s263_s21 = sshll.u32 %s423_s9, 7  ;;  %s262_s22 = sshll.u32 %s87_s20, 3 }
  0x10   : > { %s607_s18 = scalar_select %p487_p11, 1, 0 }
  0x11   : > { %s608_s19 = scalar_select %p491_p12, 1, 0 }
  0x12   : > { %s500_s25 = scalar_lea.hbm %s602_s0, %s263_s21  ;;  %s91_s26 = scalar_lea.vmem [#allocation2], %s262_s22 }
  0x13   : > { %s98_s27 = sshll.u32 %s91_s26, 4  ;;  %p504_p13 = pnand %p291_p10, %p476_p5  ;;  %s508_s27 = int_to_ptr.vmem [resolvable:$true] %s98_s27 }
  0x14   : > { %s88_s29 = scalar_lea.sflag [#allocation3], %s87_s20  ;;  %s327_s30 = scalar_lea.hbm %s500_s25, 128 }
  0x15   : > { %p328_p2 = scmp.ne.s32.totalorder %s500_s25, %s327_s30  ;;  %p329_p3 = pneg %p504_p13 }
  0x16   : > { %s332_s4 = scalar_lea.hbm %s602_s0, 256  ;;  %p333_p5 = scmp.lt.u32.totalorder %s500_s25, %s602_s0 }
  0x17   : > { %p330_p4 = pnand %p329_p3, %p328_p2  ;;  %p334_p8 = scmp.lt.u32.totalorder %s332_s4, %s327_s30 }
  0x18   : > { %p336_p9 = scmp.lt.u32.totalorder %s327_s30, %s500_s25 }
  0x19   : > { %p331_p7 = pneg %p330_p4  ;;  %p335_p10 = por %p334_p8, %p333_p5 }
  0x1b   : > { %p337_p0 = por %p336_p9, %p335_p10 }
  0x1d   : > { %p338_p1 = pnand %p337_p0, %p331_p7 }
  0x1f   : > { %341 = shalt.err (!%p338_p1)
}
  0x20   : > { %s342_s13 = scalar_lea.vmem %s508_s27, 128  ;;  %s425_s14 = smov [#allocation2]  }
  0x21   : > { %p343_p2 = scmp.ne.s32.totalorder %s508_s27, %s342_s13  ;;  %s347_s16 = sshll.u32 %s425_s14, 4  ;;  %s348_s16 = int_to_ptr.vmem [resolvable:$false] %s347_s16 }
  0x22   : > { %s349_s20 = scalar_lea.vmem %s348_s16, 256  ;;  %p350_p11 = scmp.lt.s32.totalorder %s508_s27, %s348_s16 }
  0x23   : > { %p345_p4 = pnand %p343_p2, %p329_p3  ;;  %p351_p5 = scmp.lt.s32.totalorder %s349_s20, %s342_s13 }
  0x25   : > { %p346_p12 = pneg %p345_p4  ;;  %p352_p8 = por %p351_p5, %p350_p11 }
  0x27   : > { %p353_p9 = pnand %p352_p8, %p346_p12 }
  0x29   : > { %356 = shalt.err (!%p353_p9)
}
  0x2a   : > { %286 = dma.hbm_to_vmem [thread:$0]  (!%p504_p13), %s500_s25, 128, %s508_s27, %s88_s29  }
  0x2b   : > { %p610_p0 = scmp.lt.s32.totalorder %s423_s9, 3  ;;  %p611_p1 = scmp.ge.s32.totalorder %s423_s9, 1 }
  0x2d   : > { %p104_p3 = pnand %p611_p1, %p610_p0 }
  0x2e   : > { %s542_s21 = sand.u32 (!%p104_p3), 1, %s415_s7  }
  0x2f   : > { %107 = sbr.rel (%p104_p3) target bundleno = 387 (0x183), region = 24  ;;  %s265_s22 = sshll.u32 (!%p104_p3), %s542_s21, 3 }
  0x30   : > { %s110_s23 = scalar_lea.sflag (!%p104_p3), [#allocation3], %s542_s21  ;;  %s113_s24 = scalar_lea.vmem (!%p104_p3), [#allocation2], %s265_s22 }
  0x36   : > { %402 = dma.done.wait (%p480_p6), %s110_s23, 128  }
  0x37   : > { %404 = vsyncadd (%p480_p6), %s110_s23, 4294967168  ;;  %v132_v0 = vld [vmem:[%s113_s24] sm:$0x1]  ;;  %s268_s28 = sshll.u32 %s458_s10, 7  ;;  %s131_s29 = scalar_lea.vmem [#allocation5], %s265_s22 }
  0x38   : > { %271 = vpush %v132_v0  ;;  %v133_v1 = vld [vmem:[%s113_s24] sm:$0xff]  ;;  %s189_s30 = sshll.u32 %s131_s29, 4  ;;  %s558_s4 = scalar_lea.hbm %s603_s1, %s268_s28  ;;  %s560_s30 = int_to_ptr.vmem [resolvable:$true] %s189_s30 }
  0x39   : > { %s176_s5 = scalar_lea.sflag [#allocation4], %s542_s21  ;;  %s357_s11 = scalar_lea.vmem %s560_s30, 128 }
  0x3a   : > { %p358_p6 = scmp.ne.s32.totalorder %s560_s30, %s357_s11  ;;  %p612_p11 = scmp.ne.s32.totalorder %s607_s18, 0 }
  0x3b   : > { %s426_s10 = smov [#allocation5]  }
  0x3c   : > { %p359_p12 = pnand %p358_p6, %p612_p11  ;;  %s361_s13 = sshll.u32 %s426_s10, 4  ;;  %s362_s13 = int_to_ptr.vmem [resolvable:$false] %s361_s13 }
  0x3d   : > { %s363_s14 = scalar_lea.vmem %s362_s13, 256  ;;  %p364_p7 = scmp.lt.s32.totalorder %s560_s30, %s362_s13 }
  0x3e   : > { %p360_p13 = pneg %p359_p12  ;;  %p365_p10 = scmp.lt.s32.totalorder %s363_s14, %s357_s11 }
  0x40   : > { %p366_p2 = por %p365_p10, %p364_p7 }
  0x42   : > { %p367_p4 = pnand %p366_p2, %p360_p13 }
  0x69   : > { %s272_s25 = spop %271 }
  0x6a   : > { %v136_v2 = vstv %s272_s25 }
  0x6b   : > { %v138_v3 = vsub.f32 %v133_v1, %v136_v2 }
  0x6d   : > { %139 = vadd.xlane.f32.xlu0 %v138_v3  ;;  %v149_v4 = vmul.f32 %v138_v3, %v138_v3 }
  0x71   : > { %150 = vadd.xlane.f32.xlu0 %v149_v4 }
  0xfa   : > { %v140_v5 = vpop.xlane.xlu0 %139 }
  0xfb   : > { %v141_v6 = vrot.slane %v140_v5, 4 }
  0xfd   : > { %v142_v7 = vadd.f32 %v141_v6, %v140_v5 }
  0xfe   : > { %v151_v8 = vpop.xlane.xlu0 %150 }
  0xff   : > { %v143_v9 = vrot.slane %v142_v7, 2  ;;  %v152_v10 = vrot.slane %v151_v8, 4 }
 0x101   : > { %v153_v11 = vadd.f32 %v152_v10, %v151_v8  ;;  %v144_v12 = vadd.f32 %v143_v9, %v142_v7 }
 0x103   : > { %v154_v13 = vrot.slane %v153_v11, 2  ;;  %v145_v14 = vrot.slane %v144_v12, 1 }
 0x105   : > { %v155_v15 = vadd.f32 %v154_v13, %v153_v11  ;;  %v146_v16 = vadd.f32 %v145_v14, %v144_v12 }
 0x107   : > { %273 = vpush %v146_v16  ;;  %v156_v17 = vrot.slane %v155_v15, 1 }
 0x109   : > { %v157_v18 = vadd.f32 %v156_v17, %v155_v15 }
 0x10b   : > { %275 = vpush %v157_v18 }
 0x138   : > { %s274_s17 = spop %273 }
 0x139   : > { %v148_v19 = vstv %s274_s17 }
 0x13a   : > { %v160_v20 = vmul.f32 0.0009765625, %v148_v19  ;;  %v162_v22 = vmul.f32 %v148_v19, %v148_v19 }
 0x13c   : > { %v161_v21 = vadd.f32 %v160_v20, %v132_v0  ;;  %s276_s26 = spop %275  ;;  %v163_v23 = vmul.f32 0.0009765625, %v162_v22 }
 0x13d   : > { %v159_v24 = vstv %s276_s26 }
 0x13e   : > { %277 = vpush %v161_v21  ;;  %v164_v25 = vsub.f32 %v159_v24, %v163_v23 }
 0x140   : > { %v165_v26 = vmul.f32 0.0009775171, %v164_v25 }
 0x142   : > { %v166_v27 = vmax.f32 %v165_v26, 0.0 }
 0x144   : > { %325 = vrsqrt.f32 %v166_v27 }
 0x14e   : > { %v326_v30 = vpop.eup %325 }
 0x16f   : > { %s278_s27 = spop %277 }
 0x170   : > { %v170_v28 = vstv %s278_s27 }
 0x171   : > { %v172_v29 = vsub.f32 %v133_v1, %v170_v28 }
 0x173   : > { %v173_v31 = vmul.f32 %v326_v30, %v172_v29 }
 0x175   : > { %174 = vst [vmem:[%s131_s29] sm:$0xff] %v173_v31 }
 0x176   : > { %370 = shalt.err (!%p367_p4)
}
 0x177   : > { %s371_s16 = scalar_lea.hbm %s558_s4, 128  ;;  %s375_s22 = scalar_lea.hbm %s603_s1, 256 }
 0x178   : > { %p372_p5 = scmp.ne.s32.totalorder %s558_s4, %s371_s16  ;;  %p376_p0 = scmp.lt.u32.totalorder %s558_s4, %s603_s1 }
 0x179   : > { %p377_p1 = scmp.lt.u32.totalorder %s375_s22, %s371_s16  ;;  %p379_p6 = scmp.lt.u32.totalorder %s371_s16, %s558_s4 }
 0x17a   : > { %p373_p8 = pnand %p372_p5, %p612_p11 }
 0x17b   : > { %p378_p3 = por %p377_p1, %p376_p0 }
 0x17c   : > { %p374_p9 = pneg %p373_p8 }
 0x17d   : > { %p380_p12 = por %p379_p6, %p378_p3 }
 0x17f   : > { %p381_p13 = pnand %p380_p12, %p374_p9 }
 0x181   : > { %384 = shalt.err (!%p381_p13)
}
 0x182   : > { %281 = dma.vmem_to_hbm [thread:$0]  (%p612_p11), %s560_s30, 128, %s558_s4, %s176_s5  }
 0x183 PF: > { %s201_s25 = sand.u32 1, %s411_s6   ;;  %p613_p7 = scmp.ne.s32.totalorder %s608_s19, 0 }
 0x184   : > { %p614_p10 = scmp.ge.s32.totalorder %s423_s9, 2  ;;  %s202_s17 = scalar_lea.sflag [#allocation4], %s201_s25 }
 0x186   : > { %p288_p2 = pnand %p614_p10, %p613_p7 }
 0x188   : > { %406 = dma.done.wait (!%p288_p2), %s202_s17, 128  }
 0x189   : > { %408 = vsyncadd (!%p288_p2), %s202_s17, 4294967168  ;;  %p14_p4 = scmp.ge.s32.totalorder %s462_s12, 4   ;;  %s615_s6 = smov %s415_s7 }
 0x18a   : > { %s616_s7 = smov %s419_s8  ;;  %s617_s8 = smov %s474_s15 }
 0x18b   : > { %s618_s9 = smov %s462_s12  ;;  %16 = sbr.rel (!%p14_p4) target bundleno = 5 (0x5), region = 69 }
 0x192   :  { %207 = vsyncpa [#allocation3], 1 }
 0x193   :  { %209 = vsyncpa [#allocation3 + $0x1], 1 }
 0x194   :  { %210 = vsyncpa [#allocation4], 1 }
 0x195   :  { %212 = vsyncpa [#allocation4 + $0x1], 1 }

</bundles_post_ra>
